<compile_context>
chip_gen: v7x
topology: tpu7x:2x2x1
jax: 0.10.0
libtpu: 0.0.40
codegen_flags: <defaults>
</compile_context>

<pallas_src>
import jax
import jax.numpy as jnp
from jax.experimental import pallas as pl
from jax.experimental.pallas import tpu as pltpu


def qnet_kernel(x_ref, w_ref, b_ref, out_ref):
    # x_ref  : [TM, D]   bf16  activation tile (zero-padded feature lanes)
    # w_ref  : [6, D, D] bf16  all layer weights, pre-transposed [in, out]
    # b_ref  : [6, D]    f32   all biases
    # out_ref: [TM, D]   f32   output tile (lane-dense, padded cols are zero)
    def linear(h, layer):
        w = w_ref[layer]                  # [D, D] bf16, static index
        b = b_ref[layer:layer + 1, :]     # [1, D] f32, static slice
        return jnp.dot(h.astype(jnp.bfloat16), w,
                       preferred_element_type=jnp.float32) + b

    x = x_ref[...]                        # already bf16 -> no cast in layer 0

    # input layer
    h = jax.nn.relu(linear(x, 0))

    # residual block 1
    t = jax.nn.relu(linear(h, 1))
    t = linear(t, 2)
    h = jax.nn.relu(t + h)

    # residual block 2
    t = jax.nn.relu(linear(h, 3))
    t = linear(t, 4)
    h = jax.nn.relu(t + h)

    # output layer (f32 accumulate, lane-dense store)
    out_ref[...] = linear(h, 5)


def _round_up(n, m):
    return (n + m - 1) // m * m


def _pick_tm(batch):
    """Row-tile selection per perf review.

    - batch <= 8  : one tile of exactly round_up(batch, 8) rows (latency path)
    - batch  > 8  : split into >= 2 tiles (v7x megacore) of at most 1024 rows
                    (amortizes per-step overhead, stays far under v5e's
                    16 MiB scoped-VMEM default).
    """
    bp8 = _round_up(max(batch, 1), 8)
    if bp8 <= 8:
        return bp8
    half = _round_up((bp8 + 1) // 2, 8)
    return min(1024, half)


def qnetwork_forward(x, params, *, tm=None):
    """x: [batch, input_dim] f32.  params: 6 tuples (W [in, out] f32, b [out] f32)."""
    batch, input_dim = x.shape
    hidden_dim = params[0][0].shape[1]
    output_dim = params[-1][0].shape[1]
    D = hidden_dim
    # Demo-scale assumption: pad in/out feature axes up to the (128-multiple)
    # hidden width so every layer is a lane-dense D x D matmul.
    assert D % 128 == 0 and input_dim <= D and output_dim <= D

    if tm is None:
        tm = _pick_tm(batch)
    bp = _round_up(max(batch, 1), tm)
    n_tiles = bp // tm

    # Pack all layers: zero-pad each W to [D, D] / each b to [D].
    w_packed, b_packed = [], []
    for w, b in params:
        wi, wo = w.shape
        w_packed.append(jnp.zeros((D, D), jnp.float32).at[:wi, :wo].set(w))
        b_packed.append(jnp.zeros((D,), jnp.float32).at[:wo].set(b.reshape(-1)))
    w_all = jnp.stack(w_packed).astype(jnp.bfloat16)   # [6, D, D] bf16
    b_all = jnp.stack(b_packed)                        # [6, D]    f32

    # Fused pad + cast: activations enter the kernel in bf16 (halves input DMA).
    x_pad = jnp.zeros((bp, D), jnp.bfloat16).at[:batch, :input_dim].set(
        x.astype(jnp.bfloat16))

    out = pl.pallas_call(
        qnet_kernel,
        out_shape=jax.ShapeDtypeStruct((bp, D), jnp.float32),
        grid=(n_tiles,),
        in_specs=[
            pl.BlockSpec((tm, D), lambda i: (i, 0)),        # x: pipelined per tile
            pl.BlockSpec((6, D, D), lambda i: (0, 0, 0)),   # weights: VMEM-resident
            pl.BlockSpec((6, D), lambda i: (0, 0)),         # biases: VMEM-resident
        ],
        out_specs=pl.BlockSpec((tm, D), lambda i: (i, 0)),
        compiler_params=pltpu.CompilerParams(
            dimension_semantics=("parallel",)),             # shard batch tiles on v7x
    )(x_pad, w_all, b_all)

    return out[:batch, :output_dim]


def init_params(key, input_dim, output_dim, hidden_dim):
    """He (kaiming normal, fan_in, relu) weights, zero biases — matches _init_weights."""
    dims = [
        (input_dim, hidden_dim),   # input_layer
        (hidden_dim, hidden_dim),  # hidden_layer1[0]
        (hidden_dim, hidden_dim),  # hidden_layer1[2]
        (hidden_dim, hidden_dim),  # hidden_layer2[0]
        (hidden_dim, hidden_dim),  # hidden_layer2[2]
        (hidden_dim, output_dim),  # output_layer
    ]
    params = []
    for fan_in, fan_out in dims:
        key, sub = jax.random.split(key)
        std = (2.0 / fan_in) ** 0.5
        w = std * jax.random.normal(sub, (fan_in, fan_out), dtype=jnp.float32)
        b = jnp.zeros((fan_out,), dtype=jnp.float32)
        params.append((w, b))
    return params


def reference_forward(x, params):
    """Pure-JAX reference mirroring the kernel numerics (bf16 dot inputs, f32 acc)."""
    def linear(h, w, b):
        return jnp.dot(h.astype(jnp.bfloat16), w.astype(jnp.bfloat16),
                       preferred_element_type=jnp.float32) + b

    h = jax.nn.relu(linear(x, *params[0]))
    t = jax.nn.relu(linear(h, *params[1]))
    t = linear(t, *params[2])
    h = jax.nn.relu(t + h)
    t = jax.nn.relu(linear(h, *params[3]))
    t = linear(t, *params[4])
    h = jax.nn.relu(t + h)
    return linear(h, *params[5])


if __name__ == "__main__":
    input_dim = 32
    output_dim = 64
    hidden_dim = 128

    key = jax.random.PRNGKey(0)
    key, pkey = jax.random.split(key)
    params = init_params(pkey, input_dim, output_dim, hidden_dim)

    # Small latency-path check (single 8-row tile).
    key, xkey = jax.random.split(key)
    x_small = jax.random.normal(xkey, (2, input_dim), dtype=jnp.float32)
    q_small = jax.block_until_ready(qnetwork_forward(x_small, params))
    ref_small = reference_forward(x_small, params)
    assert q_small.shape == (2, output_dim)
    assert jnp.allclose(q_small, ref_small, atol=5e-3, rtol=5e-3), (
        float(jnp.max(jnp.abs(q_small - ref_small))))

    # Multi-tile throughput-path check (2 tiles, ragged last tile padded).
    key, xkey = jax.random.split(key)
    x_big = jax.random.normal(xkey, (300, input_dim), dtype=jnp.float32)
    q_big = jax.block_until_ready(qnetwork_forward(x_big, params))
    ref_big = reference_forward(x_big, params)
    assert q_big.shape == (300, output_dim)
    assert jnp.allclose(q_big, ref_big, atol=5e-3, rtol=5e-3), (
        float(jnp.max(jnp.abs(q_big - ref_big))))

    print("KERNEL_OK")
</pallas_src>

<mosaic_0001>
module attributes {stable_mosaic.version = 11 : i64} {
  func.func @qnet_kernel(%arg0: i32, %arg1: memref<8x128xbf16, #tpu.memory_space<vmem>>, %arg2: memref<6x128x128xbf16, #tpu.memory_space<vmem>>, %arg3: memref<6x128xf32, #tpu.memory_space<vmem>>, %arg4: memref<8x128xf32, #tpu.memory_space<vmem>>) attributes {dimension_semantics = [#tpu.dimension_semantics<parallel>], iteration_bounds = array<i64: 1>, scalar_prefetch = 0 : i64, scratch_operands = 0 : i64, tpu.core_type = #tpu.core_type<tc>, window_params = [{transform_indices = @transform_0, window_bounds = array<i64: 8, 128>}, {pipeline_mode = #tpu.pipeline_mode<synchronous>, transform_indices = @transform_1, window_bounds = array<i64: 6, 128, 128>}, {pipeline_mode = #tpu.pipeline_mode<synchronous>, transform_indices = @transform_2, window_bounds = array<i64: 6, 128>}, {transform_indices = @transform_3, window_bounds = array<i64: 8, 128>}]} {
    %c0 = arith.constant 0 : index
    %c0_0 = arith.constant 0 : index
    %0 = vector.load %arg1[%c0, %c0_0] : memref<8x128xbf16, #tpu.memory_space<vmem>>, vector<8x128xbf16>
    %c0_1 = arith.constant 0 : index
    %c0_2 = arith.constant 0 : index
    %c0_3 = arith.constant 0 : index
    %1 = vector.load %arg2[%c0_1, %c0_2, %c0_3] : memref<6x128x128xbf16, #tpu.memory_space<vmem>>, vector<1x128x128xbf16>
    %2 = vector.shape_cast %1 : vector<1x128x128xbf16> to vector<128x128xbf16>
    %c0_4 = arith.constant 0 : index
    %c0_5 = arith.constant 0 : index
    %3 = vector.load %arg3[%c0_4, %c0_5] : memref<6x128xf32, #tpu.memory_space<vmem>>, vector<1x128xf32>
    %cst = arith.constant dense<0.000000e+00> : vector<8x128xf32>
    %4 = tpu.matmul %0, %2, %cst {dimension_numbers = #tpu.dot_dimension_numbers<[1], [0], [0], [1], [0, 0, 1, 1], [], []>} : vector<8x128xbf16>, vector<128x128xbf16>, vector<8x128xf32> -> vector<8x128xf32>
    %5 = vector.broadcast %3 : vector<1x128xf32> to vector<8x128xf32>
    %6 = arith.addf %4, %5 : vector<8x128xf32>
    %cst_6 = arith.constant 0.000000e+00 : f32
    %7 = vector.broadcast %cst_6 : f32 to vector<8x128xf32>
    %8 = arith.maximumf %6, %7 : vector<8x128xf32>
    %c1 = arith.constant 1 : index
    %c0_7 = arith.constant 0 : index
    %c0_8 = arith.constant 0 : index
    %9 = vector.load %arg2[%c1, %c0_7, %c0_8] : memref<6x128x128xbf16, #tpu.memory_space<vmem>>, vector<1x128x128xbf16>
    %10 = vector.shape_cast %9 : vector<1x128x128xbf16> to vector<128x128xbf16>
    %c1_9 = arith.constant 1 : index
    %c0_10 = arith.constant 0 : index
    %11 = vector.load %arg3[%c1_9, %c0_10] : memref<6x128xf32, #tpu.memory_space<vmem>>, vector<1x128xf32>
    %12 = arith.truncf %8 : vector<8x128xf32> to vector<8x128xbf16>
    %cst_11 = arith.constant dense<0.000000e+00> : vector<8x128xf32>
    %13 = tpu.matmul %12, %10, %cst_11 {dimension_numbers = #tpu.dot_dimension_numbers<[1], [0], [0], [1], [0, 0, 1, 1], [], []>} : vector<8x128xbf16>, vector<128x128xbf16>, vector<8x128xf32> -> vector<8x128xf32>
    %14 = vector.broadcast %11 : vector<1x128xf32> to vector<8x128xf32>
    %15 = arith.addf %13, %14 : vector<8x128xf32>
    %cst_12 = arith.constant 0.000000e+00 : f32
    %16 = vector.broadcast %cst_12 : f32 to vector<8x128xf32>
    %17 = arith.maximumf %15, %16 : vector<8x128xf32>
    %c2 = arith.constant 2 : index
    %c0_13 = arith.constant 0 : index
    %c0_14 = arith.constant 0 : index
    %18 = vector.load %arg2[%c2, %c0_13, %c0_14] : memref<6x128x128xbf16, #tpu.memory_space<vmem>>, vector<1x128x128xbf16>
    %19 = vector.shape_cast %18 : vector<1x128x128xbf16> to vector<128x128xbf16>
    %c2_15 = arith.constant 2 : index
    %c0_16 = arith.constant 0 : index
    %20 = vector.load %arg3[%c2_15, %c0_16] : memref<6x128xf32, #tpu.memory_space<vmem>>, vector<1x128xf32>
    %21 = arith.truncf %17 : vector<8x128xf32> to vector<8x128xbf16>
    %cst_17 = arith.constant dense<0.000000e+00> : vector<8x128xf32>
    %22 = tpu.matmul %21, %19, %cst_17 {dimension_numbers = #tpu.dot_dimension_numbers<[1], [0], [0], [1], [0, 0, 1, 1], [], []>} : vector<8x128xbf16>, vector<128x128xbf16>, vector<8x128xf32> -> vector<8x128xf32>
    %23 = vector.broadcast %20 : vector<1x128xf32> to vector<8x128xf32>
    %24 = arith.addf %22, %23 : vector<8x128xf32>
    %25 = arith.addf %24, %8 : vector<8x128xf32>
    %cst_18 = arith.constant 0.000000e+00 : f32
    %26 = vector.broadcast %cst_18 : f32 to vector<8x128xf32>
    %27 = arith.maximumf %25, %26 : vector<8x128xf32>
    %c3 = arith.constant 3 : index
    %c0_19 = arith.constant 0 : index
    %c0_20 = arith.constant 0 : index
    %28 = vector.load %arg2[%c3, %c0_19, %c0_20] : memref<6x128x128xbf16, #tpu.memory_space<vmem>>, vector<1x128x128xbf16>
    %29 = vector.shape_cast %28 : vector<1x128x128xbf16> to vector<128x128xbf16>
    %c3_21 = arith.constant 3 : index
    %c0_22 = arith.constant 0 : index
    %30 = vector.load %arg3[%c3_21, %c0_22] : memref<6x128xf32, #tpu.memory_space<vmem>>, vector<1x128xf32>
    %31 = arith.truncf %27 : vector<8x128xf32> to vector<8x128xbf16>
    %cst_23 = arith.constant dense<0.000000e+00> : vector<8x128xf32>
    %32 = tpu.matmul %31, %29, %cst_23 {dimension_numbers = #tpu.dot_dimension_numbers<[1], [0], [0], [1], [0, 0, 1, 1], [], []>} : vector<8x128xbf16>, vector<128x128xbf16>, vector<8x128xf32> -> vector<8x128xf32>
    %33 = vector.broadcast %30 : vector<1x128xf32> to vector<8x128xf32>
    %34 = arith.addf %32, %33 : vector<8x128xf32>
    %cst_24 = arith.constant 0.000000e+00 : f32
    %35 = vector.broadcast %cst_24 : f32 to vector<8x128xf32>
    %36 = arith.maximumf %34, %35 : vector<8x128xf32>
    %c4 = arith.constant 4 : index
    %c0_25 = arith.constant 0 : index
    %c0_26 = arith.constant 0 : index
    %37 = vector.load %arg2[%c4, %c0_25, %c0_26] : memref<6x128x128xbf16, #tpu.memory_space<vmem>>, vector<1x128x128xbf16>
    %38 = vector.shape_cast %37 : vector<1x128x128xbf16> to vector<128x128xbf16>
    %c4_27 = arith.constant 4 : index
    %c0_28 = arith.constant 0 : index
    %39 = vector.load %arg3[%c4_27, %c0_28] : memref<6x128xf32, #tpu.memory_space<vmem>>, vector<1x128xf32>
    %40 = arith.truncf %36 : vector<8x128xf32> to vector<8x128xbf16>
    %cst_29 = arith.constant dense<0.000000e+00> : vector<8x128xf32>
    %41 = tpu.matmul %40, %38, %cst_29 {dimension_numbers = #tpu.dot_dimension_numbers<[1], [0], [0], [1], [0, 0, 1, 1], [], []>} : vector<8x128xbf16>, vector<128x128xbf16>, vector<8x128xf32> -> vector<8x128xf32>
    %42 = vector.broadcast %39 : vector<1x128xf32> to vector<8x128xf32>
    %43 = arith.addf %41, %42 : vector<8x128xf32>
    %44 = arith.addf %43, %27 : vector<8x128xf32>
    %cst_30 = arith.constant 0.000000e+00 : f32
    %45 = vector.broadcast %cst_30 : f32 to vector<8x128xf32>
    %46 = arith.maximumf %44, %45 : vector<8x128xf32>
    %c5 = arith.constant 5 : index
    %c0_31 = arith.constant 0 : index
    %c0_32 = arith.constant 0 : index
    %47 = vector.load %arg2[%c5, %c0_31, %c0_32] : memref<6x128x128xbf16, #tpu.memory_space<vmem>>, vector<1x128x128xbf16>
    %48 = vector.shape_cast %47 : vector<1x128x128xbf16> to vector<128x128xbf16>
    %c5_33 = arith.constant 5 : index
    %c0_34 = arith.constant 0 : index
    %49 = vector.load %arg3[%c5_33, %c0_34] : memref<6x128xf32, #tpu.memory_space<vmem>>, vector<1x128xf32>
    %50 = arith.truncf %46 : vector<8x128xf32> to vector<8x128xbf16>
    %cst_35 = arith.constant dense<0.000000e+00> : vector<8x128xf32>
    %51 = tpu.matmul %50, %48, %cst_35 {dimension_numbers = #tpu.dot_dimension_numbers<[1], [0], [0], [1], [0, 0, 1, 1], [], []>} : vector<8x128xbf16>, vector<128x128xbf16>, vector<8x128xf32> -> vector<8x128xf32>
    %52 = vector.broadcast %49 : vector<1x128xf32> to vector<8x128xf32>
    %53 = arith.addf %51, %52 : vector<8x128xf32>
    %c0_36 = arith.constant 0 : index
    %c0_37 = arith.constant 0 : index
    %54 = vector.load %arg4[%c0_36, %c0_37] : memref<8x128xf32, #tpu.memory_space<vmem>>, vector<8x128xf32>
    tpu.vector_store %arg4[%c0_36, %c0_37], %53 {strides = array<i32>} : memref<8x128xf32, #tpu.memory_space<vmem>>, vector<8x128xf32>,
    return
  }
  func.func @transform_0(%arg0: i32) -> (i32, i32) {
    %c0_i32 = arith.constant 0 : i32
    %c0_i32_0 = arith.constant 0 : i32
    return %arg0, %c0_i32 : i32, i32
  }
  func.func @transform_1(%arg0: i32) -> (i32, i32, i32) {
    %c0_i32 = arith.constant 0 : i32
    %c0_i32_0 = arith.constant 0 : i32
    %c0_i32_1 = arith.constant 0 : i32
    %c0_i32_2 = arith.constant 0 : i32
    return %c0_i32, %c0_i32_0, %c0_i32_1 : i32, i32, i32
  }
  func.func @transform_2(%arg0: i32) -> (i32, i32) {
    %c0_i32 = arith.constant 0 : i32
    %c0_i32_0 = arith.constant 0 : i32
    %c0_i32_1 = arith.constant 0 : i32
    return %c0_i32, %c0_i32_0 : i32, i32
  }
  func.func @transform_3(%arg0: i32) -> (i32, i32) {
    %c0_i32 = arith.constant 0 : i32
    %c0_i32_0 = arith.constant 0 : i32
    return %arg0, %c0_i32 : i32, i32
  }
}

</mosaic_0001>

<bundles_post_ra>
// kernel: tpu_custom_call.1
= control target key start
LH: loop header
LB: loop body
LE: loop exit
PB: predicated region body
PF: predicated region fallthrough
CT: control target
= control target key end

     0   :  { %8 = vsyncpa [#allocation3], 0  ;;  %s1261_s0 = inlined_call_operand.hbm [shape: bf16[8,128], index: 0, kind: input, shape index: {}]   ;;  %s1262_s1 = inlined_call_operand.hbm [shape: bf16[6,128,128], index: 1, kind: input, shape index: {}]   ;;  %s1263_s2 = inlined_call_operand.hbm [shape: f32[6,128], index: 2, kind: input, shape index: {}]   ;;  %s1264_s3 = inlined_call_operand.hbm [shape: f32[8,128], index: 3, kind: output, shape index: {}]  }
   0x1   :  { %9 = vsyncpa [#allocation6], 0 }
   0x2   :  { %10 = vsyncpa [#allocation4], 0  ;;  %s1120_s12 = smov [#allocation5]   ;;  %s1026_s16 = scalar_lea.hbm %s1262_s1, 6144 }
   0x3   :  { %s26_s13 = sshll.u32 %s1120_s12, 4  ;;  %p1027_p0 = scmp.ne.s32.totalorder %s1262_s1, %s1026_s16  ;;  %s27_s13 = int_to_ptr.vmem [resolvable:$true] %s26_s13 }
   0x4   :  { %p1030_p1 = scmp.lt.u32.totalorder %s1026_s16, %s1262_s1 }
   0x6   :  { %p1032_p2 = pnand %p1030_p1, %p1027_p0 }
   0x8   :  { %1035 = shalt.err (!%p1032_p2)
}
   0x9   :  { %s1036_s21 = scalar_lea.vmem %s27_s13, 6144  ;;  %p1041_p4 = scmp.lt.s32.totalorder %s27_s13, %s27_s13 }
   0xa   :  { %p1037_p3 = scmp.ne.s32.totalorder %s27_s13, %s1036_s21  ;;  %p1042_p5 = scmp.lt.s32.totalorder %s1036_s21, %s1036_s21 }
   0xc   :  { %p1043_p6 = por %p1042_p5, %p1041_p4 }
   0xe   :  { %p1044_p7 = pnand %p1043_p6, %p1037_p3 }
  0x10   :  { %1047 = shalt.err (!%p1044_p7)
}
  0x11   :  { %s1121_s22 = smov 64   ;;  %s1122_s23 = smov 4  }
  0x12   :  { %32 = dma.hbm_to_vmem [thread:$0]  %s1262_s1, 6144, %s27_s13, [#allocation6], %s1121_s22, %s1121_s22, %s1122_s23  }
  0x13   :  { %s1123_s26 = smov [#allocation2]   ;;  %s1124_s28 = smov [#allocation7]  }
  0x14   :  { %s17_s27 = sshll.u32 %s1123_s26, 4  ;;  %s39_s29 = sshll.u32 %s1124_s28, 4  ;;  %s18_s27 = int_to_ptr.vmem [resolvable:$true] %s17_s27  ;;  %s40_s29 = int_to_ptr.vmem [resolvable:$true] %s39_s29 }
  0x15   :  { %s1048_s5 = scalar_lea.hbm %s1261_s0, 64 }
  0x16   :  { %p1049_p8 = scmp.ne.s32.totalorder %s1261_s0, %s1048_s5  ;;  %p1052_p9 = scmp.lt.u32.totalorder %s1048_s5, %s1261_s0 }
  0x18   :  { %p1054_p10 = pnand %p1052_p9, %p1049_p8 }
  0x1a   :  { %1057 = shalt.err (!%p1054_p10)
}
  0x1b   :  { %s1058_s1 = scalar_lea.vmem %s18_s27, 64  ;;  %p1063_p12 = scmp.lt.s32.totalorder %s18_s27, %s18_s27 }
  0x1c   :  { %p1059_p11 = scmp.ne.s32.totalorder %s18_s27, %s1058_s1  ;;  %p1064_p13 = scmp.lt.s32.totalorder %s1058_s1, %s1058_s1 }
  0x1e   :  { %p1065_p0 = por %p1064_p13, %p1063_p12 }
  0x20   :  { %p1066_p1 = pnand %p1065_p0, %p1059_p11 }
  0x22   :  { %1069 = shalt.err (!%p1066_p1)
}
  0x23   :  { %20 = dma.hbm_to_vmem [thread:$0]  %s1261_s0, 64, %s18_s27, [#allocation3]  }
  0x24   :  { %s1070_s14 = scalar_lea.hbm %s1263_s2, 128 }
  0x25   :  { %p1071_p2 = scmp.ne.s32.totalorder %s1263_s2, %s1070_s14  ;;  %p1074_p3 = scmp.lt.u32.totalorder %s1070_s14, %s1263_s2 }
  0x27   :  { %p1076_p4 = pnand %p1074_p3, %p1071_p2 }
  0x29   :  { %1079 = shalt.err (!%p1076_p4)
}
  0x2a   :  { %s1080_s19 = scalar_lea.vmem %s40_s29, 128  ;;  %p1085_p6 = scmp.lt.s32.totalorder %s40_s29, %s40_s29 }
  0x2b   :  { %p1081_p5 = scmp.ne.s32.totalorder %s40_s29, %s1080_s19  ;;  %p1086_p7 = scmp.lt.s32.totalorder %s1080_s19, %s1080_s19 }
  0x2d   :  { %p1087_p8 = por %p1086_p7, %p1085_p6 }
  0x2f   :  { %p1088_p9 = pnand %p1087_p8, %p1081_p5 }
  0x31   :  { %1091 = shalt.err (!%p1088_p9)
}
  0x32   :  { %42 = dma.hbm_to_vmem [thread:$0]  %s1263_s2, 128, %s40_s29, [#allocation6]  }
  0x33   :  { %1114 = dma.done.wait [#allocation3], 64  }
  0x34   :  { %1115 = vsyncadd [#allocation3], 4294967232 }
  0x35   :  { %1116 = dma.done.wait [#allocation6], 6272  }
  0x36   :  { %1117 = vsyncadd [#allocation6], 4294961024  ;;  %v1125_v0 = vmov 0.0   ;;  %vm1126_vm0 = vmmov 0   ;;  %v978_v1 = vld [vmem:[#allocation5] sm:$0xff]   ;;  %v979_v2 = vld [vmem:[#allocation5 + $0x8] sm:$0xff]  }
  0x37   :  { %850 = vmatprep.subr.bf16.mxu0 %v1125_v0  ;;  %866 = vmatprep.mubr.msk.bf16.mxu0 %vm1126_vm0, %v1125_v0  ;;  %v980_v3 = vld [vmem:[#allocation5 + $0x10] sm:$0xff]   ;;  %v986_v4 = vld [vmem:[#allocation5 + $0x40] sm:$0xff]   ;;  %v981_v5 = vld [vmem:[#allocation5 + $0x18] sm:$0xff]   ;;  %s1127_s2 = smov [#allocation8]  }
  0x38   :  { %870 = vmatprep.subr.bf16.mxu1 %v1125_v0  ;;  %886 = vmatprep.mubr.msk.bf16.mxu1 %vm1126_vm0, %v1125_v0  ;;  %v987_v6 = vld [vmem:[#allocation5 + $0x48] sm:$0xff]   ;;  %v982_v7 = vld [vmem:[#allocation5 + $0x20] sm:$0xff]   ;;  %v988_v8 = vld [vmem:[#allocation5 + $0x50] sm:$0xff]   ;;  %s732_s21 = sshll.u32 %s1127_s2, 4  ;;  %s733_s21 = int_to_ptr.vmem [resolvable:$true] %s732_s21 }
  0x39   :  { %851 = vmatpush3.bf16.msra.mxu0 %v978_v1  ;;  %871 = vmatpush3.bf16.msra.mxu1 %v986_v4  ;;  %v983_v9 = vld [vmem:[#allocation5 + $0x28] sm:$0xff]   ;;  %v989_v10 = vld [vmem:[#allocation5 + $0x58] sm:$0xff]   ;;  %v984_v11 = vld [vmem:[#allocation5 + $0x30] sm:$0xff]   ;;  %s1092_s22 = scalar_lea.vmem %s733_s21, 128  ;;  %p1097_p11 = scmp.lt.s32.totalorder %s733_s21, %s733_s21 }
  0x3a   :  { %852 = vmatprep.subr.bf16.mxu0 %v1125_v0  ;;  %872 = vmatprep.subr.bf16.mxu1 %v1125_v0  ;;  %v990_v12 = vld [vmem:[#allocation5 + $0x60] sm:$0xff]   ;;  %v985_v13 = vld [vmem:[#allocation5 + $0x38] sm:$0xff]   ;;  %v991_v14 = vld [vmem:[#allocation5 + $0x68] sm:$0xff]   ;;  %p1093_p10 = scmp.ne.s32.totalorder %s733_s21, %s1092_s22  ;;  %p1098_p12 = scmp.lt.s32.totalorder %s1092_s22, %s1092_s22 }
  0x3b   :  { %v53_v15 = vld [vmem:[#allocation2] sm:$0xf]  ;;  %v992_v16 = vld [vmem:[#allocation5 + $0x70] sm:$0xff]   ;;  %v994_v18 = vld [vmem:[#allocation5 + $0x80] sm:$0xff]  }
  0x3c   :  { %v993_v17 = vld [vmem:[#allocation5 + $0x78] sm:$0xff]   ;;  %v995_v19 = vld [vmem:[#allocation5 + $0x88] sm:$0xff]   ;;  %v996_v20 = vld [vmem:[#allocation5 + $0x90] sm:$0xff]   ;;  %p1099_p13 = por %p1098_p12, %p1097_p11 }
  0x3d   :  { %853 = vmatpush3.bf16.msra.mxu0 %v979_v2  ;;  %873 = vmatpush3.bf16.msra.mxu1 %v987_v6  ;;  %v997_v21 = vld [vmem:[#allocation5 + $0x98] sm:$0xff]   ;;  %v998_v22 = vld [vmem:[#allocation5 + $0xa0] sm:$0xff]   ;;  %v999_v23 = vld [vmem:[#allocation5 + $0xa8] sm:$0xff]  }
  0x3e   :  { %854 = vmatprep.subr.bf16.mxu0 %v1125_v0  ;;  %874 = vmatprep.subr.bf16.mxu1 %v1125_v0  ;;  %v742_v24 = vld [vmem:[#allocation7] ss:$0 sm:$0xff]  ;;  %v1000_v32 = vld [vmem:[#allocation5 + $0xb0] sm:$0xff]   ;;  %v1001_v33 = vld [vmem:[#allocation5 + $0xb8] sm:$0xff]   ;;  %p1100_p0 = pnand %p1099_p13, %p1093_p10 }
  0x3f   :  { %v1002_v34 = vld [vmem:[#allocation5 + $0xc0] sm:$0xff]   ;;  %v1003_v35 = vld [vmem:[#allocation5 + $0xc8] sm:$0xff]   ;;  %v1004_v36 = vld [vmem:[#allocation5 + $0xd0] sm:$0xff]  }
  0x40   :  { %v1005_v37 = vld [vmem:[#allocation5 + $0xd8] sm:$0xff]   ;;  %v1006_v38 = vld [vmem:[#allocation5 + $0xe0] sm:$0xff]   ;;  %v1007_v39 = vld [vmem:[#allocation5 + $0xe8] sm:$0xff]  }
  0x41   :  { %855 = vmatpush3.bf16.msra.mxu0 %v980_v3  ;;  %875 = vmatpush3.bf16.msra.mxu1 %v988_v8  ;;  %v751_v40 = vld [vmem:[#allocation7 + $0x1] ss:$0 sm:$0xff]  ;;  %v1008_v48 = vld [vmem:[#allocation5 + $0xf0] sm:$0xff]   ;;  %v1009_v49 = vld [vmem:[#allocation5 + $0xf8] sm:$0xff]  }
  0x42   :  { %856 = vmatprep.subr.bf16.mxu0 %v1125_v0  ;;  %876 = vmatprep.subr.bf16.mxu1 %v1125_v0  ;;  %v1010_v50 = vld [vmem:[#allocation5 + $0x100] sm:$0xff]   ;;  %v1011_v51 = vld [vmem:[#allocation5 + $0x108] sm:$0xff]   ;;  %v1012_v52 = vld [vmem:[#allocation5 + $0x110] sm:$0xff]  }
  0x43   :  { %v1013_v53 = vld [vmem:[#allocation5 + $0x118] sm:$0xff]   ;;  %v1014_v54 = vld [vmem:[#allocation5 + $0x120] sm:$0xff]   ;;  %v1015_v55 = vld [vmem:[#allocation5 + $0x128] sm:$0xff]  }
  0x44   :  { %v760_v56 = vld [vmem:[#allocation7 + $0x2] ss:$0 sm:$0xff]  ;;  %v1016_v2 = vld [vmem:[#allocation5 + $0x130] sm:$0xff]   ;;  %v1017_v3 = vld [vmem:[#allocation5 + $0x138] sm:$0xff]  }
  0x45   :  { %857 = vmatpush3.bf16.msra.mxu0 %v981_v5  ;;  %877 = vmatpush3.bf16.msra.mxu1 %v989_v10  ;;  %v1018_v4 = vld [vmem:[#allocation5 + $0x140] sm:$0xff]   ;;  %v1019_v5 = vld [vmem:[#allocation5 + $0x148] sm:$0xff]   ;;  %v1020_v6 = vld [vmem:[#allocation5 + $0x150] sm:$0xff]  }
  0x46   :  { %858 = vmatprep.subr.bf16.mxu0 %v1125_v0  ;;  %878 = vmatprep.subr.bf16.mxu1 %v1125_v0  ;;  %v1022_v8 = vld [vmem:[#allocation5 + $0x160] sm:$0xff]  }
  0x47   :  { %v769_v10 = vld [vmem:[#allocation7 + $0x3] ss:$0 sm:$0xff] }
  0x49   :  { %859 = vmatpush3.bf16.msra.mxu0 %v982_v7  ;;  %879 = vmatpush3.bf16.msra.mxu1 %v990_v12  ;;  %v1021_v7 = vld [vmem:[#allocation5 + $0x158] sm:$0xff]  }
  0x4a   :  { %860 = vmatprep.subr.bf16.mxu0 %v1125_v0  ;;  %880 = vmatprep.subr.bf16.mxu1 %v1125_v0 }
  0x4d   :  { %861 = vmatpush3.bf16.msra.mxu0 %v983_v9  ;;  %881 = vmatpush3.bf16.msra.mxu1 %v991_v14  ;;  %v1023_v9 = vld [vmem:[#allocation5 + $0x168] sm:$0xff]  }
  0x4e   :  { %862 = vmatprep.subr.bf16.mxu0 %v1125_v0  ;;  %882 = vmatprep.subr.bf16.mxu1 %v1125_v0 }
  0x51   :  { %863 = vmatpush3.bf16.msra.mxu0 %v984_v11  ;;  %883 = vmatpush3.bf16.msra.mxu1 %v992_v16 }
  0x52   :  { %864 = vmatprep.subr.bf16.mxu0 %v1125_v0  ;;  %884 = vmatprep.subr.bf16.mxu1 %v1125_v0 }
  0x55   :  { %865 = vmatpush3.bf16.msra.mxu0 %v985_v13  ;;  %885 = vmatpush3.bf16.msra.mxu1 %v993_v17 }
  0x56   :  { %890 = vmatprep.subr.bf16.mxu0 %v1125_v0  ;;  %910 = vmatprep.subr.bf16.mxu1 %v1125_v0 }
  0x58   :  { %867 = vmatmul.mubr.bf16.vlgmr.msra.gmra.mrb[0].mxu0 %v53_v15 }
  0x59   :  { %906 = vmatprep.mubr.msk.bf16.mxu0 %vm1126_vm0, %v1125_v0  ;;  %891 = vmatpush3.bf16.msra.mxu0 %v994_v18  ;;  %v1024_v18 = vld [vmem:[#allocation5 + $0x170] sm:$0xff]  }
  0x5a   :  { %892 = vmatprep.subr.bf16.mxu0 %v1125_v0 }
  0x5d   :  { %893 = vmatpush3.bf16.msra.mxu0 %v995_v19  ;;  %v1025_v19 = vld [vmem:[#allocation5 + $0x178] sm:$0xff]  }
  0x5e   :  { %894 = vmatprep.subr.bf16.mxu0 %v1125_v0 }
  0x61   :  { %895 = vmatpush3.bf16.msra.mxu0 %v996_v20  ;;  %v778_v20 = vld [vmem:[#allocation7 + $0x4] ss:$0 sm:$0xff] }
  0x62   :  { %896 = vmatprep.subr.bf16.mxu0 %v1125_v0 }
  0x65   :  { %897 = vmatpush3.bf16.msra.mxu0 %v997_v21 }
  0x66   :  { %898 = vmatprep.subr.bf16.mxu0 %v1125_v0 }
  0x69   :  { %899 = vmatpush3.bf16.msra.mxu0 %v998_v22 }
  0x6a   :  { %900 = vmatprep.subr.bf16.mxu0 %v1125_v0 }
  0x6d   :  { %901 = vmatpush3.bf16.msra.mxu0 %v999_v23 }
  0x6e   :  { %902 = vmatprep.subr.bf16.mxu0 %v1125_v0 }
  0x71   :  { %903 = vmatpush3.bf16.msra.mxu0 %v1000_v32 }
  0x72   :  { %904 = vmatprep.subr.bf16.mxu0 %v1125_v0 }
  0x75   :  { %905 = vmatpush3.bf16.msra.mxu0 %v1001_v33 }
  0x76   :  { %930 = vmatprep.subr.bf16.mxu0 %v1125_v0 }
 0x12b   :  { %v157_v25 = vpop.f32.mrb[0].mxu0 }
 0x12c   :  { %v158_v26 = vadd.f32 %v742_v24, %v157_v25  ;;  %v868_v27 = vpop.f32.mrb[1].mxu0 }
 0x12d   :  { %v160_v28 = vpop.f32.mrb[2].mxu0 }
 0x12e   :  { %v1214_v29 = vmax.f32 %v158_v26, 0.0  ;;  %v869_v30 = vpop.f32.mrb[3].mxu0 }
 0x130   :  { %v182_v31 = vpack.c.bf16 %v1214_v29, %v1214_v29 }
 0x132   :  { %887 = vmatmul.mubr.bf16.vlgmr.msra.gmra.mrb[0].mxu1 %v182_v31 }
 0x133   :  { %926 = vmatprep.mubr.msk.bf16.mxu1 %vm1126_vm0, %v1125_v0  ;;  %911 = vmatpush3.bf16.msra.mxu1 %v1002_v34 }
 0x134   :  { %912 = vmatprep.subr.bf16.mxu1 %v1125_v0 }
 0x137   :  { %913 = vmatpush3.bf16.msra.mxu1 %v1003_v35 }
 0x138   :  { %914 = vmatprep.subr.bf16.mxu1 %v1125_v0 }
 0x13b   :  { %915 = vmatpush3.bf16.msra.mxu1 %v1004_v36 }
 0x13c   :  { %916 = vmatprep.subr.bf16.mxu1 %v1125_v0 }
 0x13f   :  { %917 = vmatpush3.bf16.msra.mxu1 %v1005_v37 }
 0x140   :  { %918 = vmatprep.subr.bf16.mxu1 %v1125_v0 }
 0x143   :  { %919 = vmatpush3.bf16.msra.mxu1 %v1006_v38 }
 0x144   :  { %920 = vmatprep.subr.bf16.mxu1 %v1125_v0 }
 0x147   :  { %921 = vmatpush3.bf16.msra.mxu1 %v1007_v39 }
 0x148   :  { %922 = vmatprep.subr.bf16.mxu1 %v1125_v0 }
 0x14b   :  { %923 = vmatpush3.bf16.msra.mxu1 %v1008_v48 }
 0x14c   :  { %924 = vmatprep.subr.bf16.mxu1 %v1125_v0 }
 0x14f   :  { %925 = vmatpush3.bf16.msra.mxu1 %v1009_v49 }
 0x150   :  { %950 = vmatprep.subr.bf16.mxu1 %v1125_v0 }
 0x205   :  { %v269_v41 = vpop.f32.mrb[0].mxu1 }
 0x206   :  { %v270_v42 = vadd.f32 %v751_v40, %v269_v41  ;;  %v888_v43 = vpop.f32.mrb[1].mxu1 }
 0x207   :  { %v272_v44 = vpop.f32.mrb[2].mxu1 }
 0x208   :  { %v275_v45 = vmax.f32 %v270_v42, 0.0  ;;  %v889_v46 = vpop.f32.mrb[3].mxu1 }
 0x20a   :  { %v294_v47 = vpack.c.bf16 %v275_v45, %v275_v45 }
 0x20c   :  { %907 = vmatmul.mubr.bf16.vlgmr.msra.gmra.mrb[4].mxu0 %v294_v47 }
 0x20d   :  { %946 = vmatprep.mubr.msk.bf16.mxu0 %vm1126_vm0, %v1125_v0  ;;  %931 = vmatpush3.bf16.msra.mxu0 %v1010_v50 }
 0x20e   :  { %932 = vmatprep.subr.bf16.mxu0 %v1125_v0 }
 0x211   :  { %933 = vmatpush3.bf16.msra.mxu0 %v1011_v51 }
 0x212   :  { %934 = vmatprep.subr.bf16.mxu0 %v1125_v0 }
 0x215   :  { %935 = vmatpush3.bf16.msra.mxu0 %v1012_v52 }
 0x216   :  { %936 = vmatprep.subr.bf16.mxu0 %v1125_v0 }
 0x219   :  { %937 = vmatpush3.bf16.msra.mxu0 %v1013_v53 }
 0x21a   :  { %938 = vmatprep.subr.bf16.mxu0 %v1125_v0 }
 0x21d   :  { %939 = vmatpush3.bf16.msra.mxu0 %v1014_v54 }
 0x21e   :  { %940 = vmatprep.subr.bf16.mxu0 %v1125_v0 }
 0x221   :  { %941 = vmatpush3.bf16.msra.mxu0 %v1015_v55 }
 0x222   :  { %942 = vmatprep.subr.bf16.mxu0 %v1125_v0 }
 0x225   :  { %943 = vmatpush3.bf16.msra.mxu0 %v1016_v2 }
 0x226   :  { %944 = vmatprep.subr.bf16.mxu0 %v1125_v0 }
 0x229   :  { %945 = vmatpush3.bf16.msra.mxu0 %v1017_v3 }
 0x2df   :  { %v381_v57 = vpop.f32.mrb[4].mxu0 }
 0x2e0   :  { %v382_v58 = vadd.f32 %v760_v56, %v381_v57  ;;  %v908_v59 = vpop.f32.mrb[5].mxu0 }
 0x2e1   :  { %v384_v60 = vpop.f32.mrb[6].mxu0 }
 0x2e2   :  { %v387_v61 = vadd.f32 %v382_v58, %v1214_v29  ;;  %v909_v62 = vpop.f32.mrb[7].mxu0  ;;  %v787_v29 = vld [vmem:[#allocation7 + $0x5] ss:$0 sm:$0xff] }
 0x2e4   :  { %v388_v63 = vmax.f32 %v387_v61, 0.0 }
 0x2e6   :  { %v407_v1 = vpack.c.bf16 %v388_v63, %v388_v63 }
 0x2e8   :  { %927 = vmatmul.mubr.bf16.vlgmr.msra.gmra.mrb[4].mxu1 %v407_v1 }
 0x2e9   :  { %966 = vmatprep.mubr.msk.bf16.mxu1 %vm1126_vm0, %v1125_v0  ;;  %951 = vmatpush3.bf16.msra.mxu1 %v1018_v4 }
 0x2ea   :  { %952 = vmatprep.subr.bf16.mxu1 %v1125_v0 }
 0x2ed   :  { %953 = vmatpush3.bf16.msra.mxu1 %v1019_v5 }
 0x2ee   :  { %954 = vmatprep.subr.bf16.mxu1 %v1125_v0 }
 0x2f1   :  { %955 = vmatpush3.bf16.msra.mxu1 %v1020_v6 }
 0x2f2   :  { %956 = vmatprep.subr.bf16.mxu1 %v1125_v0 }
 0x2f5   :  { %957 = vmatpush3.bf16.msra.mxu1 %v1021_v7 }
 0x2f6   :  { %958 = vmatprep.subr.bf16.mxu1 %v1125_v0 }
 0x2f9   :  { %959 = vmatpush3.bf16.msra.mxu1 %v1022_v8 }
 0x2fa   :  { %960 = vmatprep.subr.bf16.mxu1 %v1125_v0 }
 0x2fd   :  { %961 = vmatpush3.bf16.msra.mxu1 %v1023_v9 }
 0x2fe   :  { %962 = vmatprep.subr.bf16.mxu1 %v1125_v0 }
 0x301   :  { %963 = vmatpush3.bf16.msra.mxu1 %v1024_v18 }
 0x302   :  { %964 = vmatprep.subr.bf16.mxu1 %v1125_v0 }
 0x305   :  { %965 = vmatpush3.bf16.msra.mxu1 %v1025_v19 }
 0x3bb   :  { %v494_v11 = vpop.f32.mrb[4].mxu1 }
 0x3bc   :  { %v495_v12 = vadd.f32 %v769_v10, %v494_v11  ;;  %v928_v13 = vpop.f32.mrb[5].mxu1 }
 0x3bd   :  { %v497_v14 = vpop.f32.mrb[6].mxu1 }
 0x3be   :  { %v500_v15 = vmax.f32 %v495_v12, 0.0  ;;  %v929_v16 = vpop.f32.mrb[7].mxu1 }
 0x3c0   :  { %v519_v17 = vpack.c.bf16 %v500_v15, %v500_v15 }
 0x3c2   :  { %947 = vmatmul.mubr.bf16.vlgmr.msra.gmra.mrb[8].mxu0 %v519_v17 }
 0x495   :  { %v606_v21 = vpop.f32.mrb[8].mxu0 }
 0x496   :  { %v607_v22 = vadd.f32 %v778_v20, %v606_v21  ;;  %v948_v23 = vpop.f32.mrb[9].mxu0 }
 0x497   :  { %v609_v24 = vpop.f32.mrb[10].mxu0 }
 0x498   :  { %v612_v25 = vadd.f32 %v607_v22, %v388_v63  ;;  %v949_v26 = vpop.f32.mrb[11].mxu0 }
 0x49a   :  { %v613_v27 = vmax.f32 %v612_v25, 0.0 }
 0x49c   :  { %v632_v28 = vpack.c.bf16 %v613_v27, %v613_v27 }
 0x49e   :  { %967 = vmatmul.mubr.bf16.vlgmr.msra.gmra.mrb[8].mxu1 %v632_v28 }
 0x571   :  { %v719_v30 = vpop.f32.mrb[8].mxu1 }
 0x572   :  { %v720_v31 = vadd.f32 %v787_v29, %v719_v30  ;;  %v968_v32 = vpop.f32.mrb[9].mxu1 }
 0x573   :  { %v722_v0 = vpop.f32.mrb[10].mxu1 }
 0x574   :  { %725 = vst [vmem:[#allocation8] sm:$0xff] %v720_v31  ;;  %v969_v33 = vpop.f32.mrb[11].mxu1 }
 0x575   :  { %1103 = shalt.err (!%p1100_p0)
}
 0x576   :  { %s1104_s25 = scalar_lea.hbm %s1264_s3, 128 }
 0x577   :  { %p1105_p1 = scmp.ne.s32.totalorder %s1264_s3, %s1104_s25  ;;  %p1108_p2 = scmp.lt.u32.totalorder %s1104_s25, %s1264_s3 }
 0x579   :  { %p1110_p3 = pnand %p1108_p2, %p1105_p1 }
 0x57b   :  { %1113 = shalt.err (!%p1110_p3)
}
 0x57c   :  { %735 = dma.vmem_to_hbm [thread:$0]  %s733_s21, 128, %s1264_s3, [#allocation4]  }
 0x57d   :  { %1118 = dma.done.wait [#allocation4], 128  }
 0x57e   :  { %1119 = vsyncadd [#allocation4], 4294967168 }
 0x57f   :  { %739 = vsyncpa [#allocation3], 1 }
 0x580   :  { %740 = vsyncpa [#allocation6], 1 }
 0x581   :  { %741 = vsyncpa [#allocation4], 1 }

</bundles_post_ra>
